<compile_context>
chip_gen: v7x
topology: tpu7x:2x2x1
jax: 0.10.0
libtpu: 0.0.40
codegen_flags: <defaults>
</compile_context>

<pallas_src>
import math

import jax
import jax.numpy as jnp
from jax import lax
from jax.experimental import pallas as pl
from jax.experimental.pallas import tpu as pltpu


def _round_up(v, m):
    return (v + m - 1) // m * m


def _pad2d(a, rows, cols):
    pr, pc = rows - a.shape[0], cols - a.shape[1]
    if pr == 0 and pc == 0:
        return a
    return jnp.pad(a, ((0, pr), (0, pc)))


def _erf(z):
    # Abramowitz & Stegun 7.1.26: max abs error 1.5e-7 (f32-level "exact").
    # Uses only VPU ops + one EUP exp + one divide -> always lowers in Mosaic.
    a1, a2, a3, a4, a5 = 0.254829592, -0.284496736, 1.421413741, -1.453152027, 1.061405429
    p = 0.3275911
    s = jnp.where(z < 0.0, -1.0, 1.0).astype(z.dtype)
    az = jnp.abs(z)
    t = 1.0 / (1.0 + p * az)
    poly = ((((a5 * t + a4) * t + a3) * t + a2) * t + a1) * t
    return s * (1.0 - poly * jnp.exp(-az * az))


def _mlp_kernel(x_ref, w1_ref, b1_ref, w2_ref, b2_ref, o_ref):
    # One M-tile per grid step; weights/biases are VMEM-resident full blocks.
    x = x_ref[...].astype(w1_ref.dtype)          # no-op when dtypes already match

    # dense_layer: x @ W1 + b1   (MXU matmul, f32 accumulation)
    h = jnp.dot(x, w1_ref[...], preferred_element_type=jnp.float32)
    h = h + b1_ref[...].astype(jnp.float32)

    # nn.GELU() default = exact erf formulation
    h = 0.5 * h * (1.0 + _erf(h * (1.0 / math.sqrt(2.0))))

    # dense_to_labels_layer: h @ W2 + b2
    out = jnp.dot(h.astype(w2_ref.dtype), w2_ref[...],
                  preferred_element_type=jnp.float32)
    out = out + b2_ref[...].astype(jnp.float32)

    o_ref[...] = out.astype(o_ref.dtype)


def mlp_classifier_forward(x, w1, b1, w2, b2, *, block_m=256, compute_dtype=None):
    """x: [batch, seq, hidden]  ->  [batch, seq, num_labels]

    w1: [hidden, hidden]      (stored transposed: in x out)
    b1: [hidden] or [1, hidden]
    w2: [hidden, num_labels]
    b2: [num_labels] or [1, num_labels]
    compute_dtype: optionally cast x / weights (e.g. jnp.bfloat16) to halve
        streamed HBM bytes; biases stay f32 and accumulation is always f32.
    """
    batch, seq, hidden = x.shape
    num_labels = w2.shape[1]

    b1 = b1.reshape(1, hidden)
    b2 = b2.reshape(1, num_labels)

    if compute_dtype is not None:
        x = x.astype(compute_dtype)
        w1 = w1.astype(compute_dtype)
        w2 = w2.astype(compute_dtype)

    # --- pad feature dims to lane-dense multiples of 128 (math unchanged).
    h_pad = _round_up(hidden, 128)
    n_pad = _round_up(num_labels, 128)

    w1p = _pad2d(w1, h_pad, h_pad)
    b1p = _pad2d(b1, 1, h_pad)
    w2p = _pad2d(w2, h_pad, n_pad)
    b2p = _pad2d(b2, 1, n_pad)

    # --- flatten (batch, seq) -> M and pad M to a multiple of the M-tile.
    m = batch * seq
    sublane = 8 * 4 // jnp.dtype(x.dtype).itemsize       # 8 for f32, 16 for bf16
    block_m = max(sublane, min(block_m, _round_up(m, sublane)))
    block_m = _round_up(block_m, sublane)
    m_pad = _round_up(m, block_m)

    x2d = _pad2d(x.reshape(m, hidden), m_pad, h_pad)

    # --- VMEM budget: resident weights (pipeline may double-buffer) +
    #     streamed x/out tiles + f32 intermediates, with headroom.  Cap at
    #     64 MiB so v7x (64 MiB physical VMEM) stays legal.
    isz = lambda a: jnp.dtype(a.dtype).itemsize
    est = 2 * (w1p.size * isz(w1p) + w2p.size * isz(w2p)
               + b1p.size * isz(b1p) + b2p.size * isz(b2p)
               + block_m * h_pad * isz(x2d) + block_m * n_pad * isz(x2d))
    est += 4 * block_m * h_pad * 4                        # f32 h / GELU temporaries
    vmem_limit = int(min(max(est * 2, 32 * 1024 * 1024), 64 * 1024 * 1024))

    grid = (m_pad // block_m,)

    out2d = pl.pallas_call(
        _mlp_kernel,
        out_shape=jax.ShapeDtypeStruct((m_pad, n_pad), x.dtype),
        grid_spec=pltpu.PrefetchScalarGridSpec(
            num_scalar_prefetch=0,
            grid=grid,
            in_specs=[
                pl.BlockSpec((block_m, h_pad), lambda i: (i, 0)),    # x tile (streamed)
                pl.BlockSpec((h_pad, h_pad), lambda i: (0, 0)),      # W1 (resident)
                pl.BlockSpec((1, h_pad), lambda i: (0, 0)),          # b1 (resident)
                pl.BlockSpec((h_pad, n_pad), lambda i: (0, 0)),      # W2 (resident)
                pl.BlockSpec((1, n_pad), lambda i: (0, 0)),          # b2 (resident)
            ],
            out_specs=pl.BlockSpec((block_m, n_pad), lambda i: (i, 0)),
        ),
        compiler_params=pltpu.CompilerParams(
            dimension_semantics=("parallel",),
            vmem_limit_bytes=vmem_limit,
        ),
    )(x2d, w1p, b1p, w2p, b2p)

    return out2d[:m, :num_labels].reshape(batch, seq, num_labels)


def _reference(x, w1, b1, w2, b2):
    h = jnp.einsum("bsh,hk->bsk", x.astype(jnp.float32), w1.astype(jnp.float32),
                   precision=lax.Precision.HIGHEST) + b1.reshape(-1)
    h = 0.5 * h * (1.0 + lax.erf(h / math.sqrt(2.0)))
    return jnp.einsum("bsh,hk->bsk", h, w2.astype(jnp.float32),
                      precision=lax.Precision.HIGHEST) + b2.reshape(-1)


if __name__ == "__main__":
    hidden_size = 32
    num_labels = 8
    batch, seq = 2, 8

    key = jax.random.PRNGKey(0)
    kx, kw1, kb1, kw2, kb2 = jax.random.split(key, 5)

    # Deterministic parameter init (shapes match nn.Linear(hidden, hidden) and
    # nn.Linear(hidden, num_labels)); stored transposed as [in, out].
    bound1 = 1.0 / math.sqrt(hidden_size)
    w1 = jax.random.uniform(kw1, (hidden_size, hidden_size), jnp.float32, -bound1, bound1)
    b1 = jax.random.uniform(kb1, (1, hidden_size), jnp.float32, -bound1, bound1)
    w2 = jax.random.uniform(kw2, (hidden_size, num_labels), jnp.float32, -bound1, bound1)
    b2 = jax.random.uniform(kb2, (1, num_labels), jnp.float32, -bound1, bound1)

    x = jax.random.normal(kx, (batch, seq, hidden_size), jnp.float32)

    out = mlp_classifier_forward(x, w1, b1, w2, b2)
    out = jax.block_until_ready(out)

    ref = _reference(x, w1, b1, w2, b2)
    assert out.shape == (batch, seq, num_labels)
    assert jnp.allclose(out, ref, atol=2e-4, rtol=2e-4), "mismatch vs reference"

    print("KERNEL_OK")
</pallas_src>

<mosaic_0001>
module attributes {stable_mosaic.version = 11 : i64} {
  func.func @_mlp_kernel(%arg0: i32, %arg1: memref<16x128xf32, #tpu.memory_space<vmem>>, %arg2: memref<128x128xf32, #tpu.memory_space<vmem>>, %arg3: memref<1x128xf32, #tpu.memory_space<vmem>>, %arg4: memref<128x128xf32, #tpu.memory_space<vmem>>, %arg5: memref<1x128xf32, #tpu.memory_space<vmem>>, %arg6: memref<16x128xf32, #tpu.memory_space<vmem>>) attributes {dimension_semantics = [#tpu.dimension_semantics<parallel>], iteration_bounds = array<i64: 1>, scalar_prefetch = 0 : i64, scratch_operands = 0 : i64, tpu.core_type = #tpu.core_type<tc>, window_params = [{transform_indices = @transform_0, window_bounds = array<i64: 16, 128>}, {pipeline_mode = #tpu.pipeline_mode<synchronous>, transform_indices = @transform_1, window_bounds = array<i64: 128, 128>}, {pipeline_mode = #tpu.pipeline_mode<synchronous>, transform_indices = @transform_2, window_bounds = array<i64: 1, 128>}, {pipeline_mode = #tpu.pipeline_mode<synchronous>, transform_indices = @transform_3, window_bounds = array<i64: 128, 128>}, {pipeline_mode = #tpu.pipeline_mode<synchronous>, transform_indices = @transform_4, window_bounds = array<i64: 1, 128>}, {transform_indices = @transform_5, window_bounds = array<i64: 16, 128>}]} {
    %c0 = arith.constant 0 : index
    %c0_0 = arith.constant 0 : index
    %0 = vector.load %arg1[%c0, %c0_0] : memref<16x128xf32, #tpu.memory_space<vmem>>, vector<16x128xf32>
    %c0_1 = arith.constant 0 : index
    %c0_2 = arith.constant 0 : index
    %1 = vector.load %arg2[%c0_1, %c0_2] : memref<128x128xf32, #tpu.memory_space<vmem>>, vector<128x128xf32>
    %cst = arith.constant dense<0.000000e+00> : vector<16x128xf32>
    %2 = tpu.matmul %0, %1, %cst {dimension_numbers = #tpu.dot_dimension_numbers<[1], [0], [0], [1], [0, 0, 1, 1], [], []>} : vector<16x128xf32>, vector<128x128xf32>, vector<16x128xf32> -> vector<16x128xf32>
    %c0_3 = arith.constant 0 : index
    %c0_4 = arith.constant 0 : index
    %3 = vector.load %arg3[%c0_3, %c0_4] : memref<1x128xf32, #tpu.memory_space<vmem>>, vector<1x128xf32>
    %4 = vector.broadcast %3 : vector<1x128xf32> to vector<16x128xf32>
    %5 = arith.addf %2, %4 : vector<16x128xf32>
    %cst_5 = arith.constant 5.000000e-01 : f32
    %6 = vector.broadcast %cst_5 : f32 to vector<16x128xf32>
    %7 = arith.mulf %6, %5 : vector<16x128xf32>
    %cst_6 = arith.constant 0.707106769 : f32
    %8 = vector.broadcast %cst_6 : f32 to vector<16x128xf32>
    %9 = arith.mulf %5, %8 : vector<16x128xf32>
    %cst_7 = arith.constant 0.000000e+00 : f32
    %10 = vector.broadcast %cst_7 : f32 to vector<16x128xf32>
    %11 = arith.cmpf olt, %9, %10 : vector<16x128xf32>
    %cst_8 = arith.constant -1.000000e+00 : f32
    %cst_9 = arith.constant 1.000000e+00 : f32
    %12 = vector.broadcast %cst_8 : f32 to vector<16x128xf32>
    %13 = vector.broadcast %cst_9 : f32 to vector<16x128xf32>
    %14 = arith.select %11, %12, %13 : vector<16x128xi1>, vector<16x128xf32>
    %15 = math.absf %9 : vector<16x128xf32>
    %cst_10 = arith.constant 0.327591091 : f32
    %16 = vector.broadcast %cst_10 : f32 to vector<16x128xf32>
    %17 = arith.mulf %16, %15 : vector<16x128xf32>
    %cst_11 = arith.constant 1.000000e+00 : f32
    %18 = vector.broadcast %cst_11 : f32 to vector<16x128xf32>
    %19 = arith.addf %18, %17 : vector<16x128xf32>
    %cst_12 = arith.constant 1.000000e+00 : f32
    %20 = vector.broadcast %cst_12 : f32 to vector<16x128xf32>
    %21 = arith.divf %20, %19 : vector<16x128xf32>
    %cst_13 = arith.constant 1.06140542 : f32
    %22 = vector.broadcast %cst_13 : f32 to vector<16x128xf32>
    %23 = arith.mulf %22, %21 : vector<16x128xf32>
    %cst_14 = arith.constant -1.45315206 : f32
    %24 = vector.broadcast %cst_14 : f32 to vector<16x128xf32>
    %25 = arith.addf %23, %24 : vector<16x128xf32>
    %26 = arith.mulf %25, %21 : vector<16x128xf32>
    %cst_15 = arith.constant 1.42141378 : f32
    %27 = vector.broadcast %cst_15 : f32 to vector<16x128xf32>
    %28 = arith.addf %26, %27 : vector<16x128xf32>
    %29 = arith.mulf %28, %21 : vector<16x128xf32>
    %cst_16 = arith.constant -0.284496725 : f32
    %30 = vector.broadcast %cst_16 : f32 to vector<16x128xf32>
    %31 = arith.addf %29, %30 : vector<16x128xf32>
    %32 = arith.mulf %31, %21 : vector<16x128xf32>
    %cst_17 = arith.constant 0.254829586 : f32
    %33 = vector.broadcast %cst_17 : f32 to vector<16x128xf32>
    %34 = arith.addf %32, %33 : vector<16x128xf32>
    %35 = arith.mulf %34, %21 : vector<16x128xf32>
    %cst_18 = arith.constant 0.000000e+00 : f32
    %36 = vector.broadcast %cst_18 : f32 to vector<16x128xf32>
    %37 = arith.subf %36, %15 : vector<16x128xf32>
    %38 = arith.mulf %37, %15 : vector<16x128xf32>
    %39 = math.exp %38 : vector<16x128xf32>
    %40 = arith.mulf %35, %39 : vector<16x128xf32>
    %cst_19 = arith.constant 1.000000e+00 : f32
    %41 = vector.broadcast %cst_19 : f32 to vector<16x128xf32>
    %42 = arith.subf %41, %40 : vector<16x128xf32>
    %43 = arith.mulf %14, %42 : vector<16x128xf32>
    %cst_20 = arith.constant 1.000000e+00 : f32
    %44 = vector.broadcast %cst_20 : f32 to vector<16x128xf32>
    %45 = arith.addf %44, %43 : vector<16x128xf32>
    %46 = arith.mulf %7, %45 : vector<16x128xf32>
    %c0_21 = arith.constant 0 : index
    %c0_22 = arith.constant 0 : index
    %47 = vector.load %arg4[%c0_21, %c0_22] : memref<128x128xf32, #tpu.memory_space<vmem>>, vector<128x128xf32>
    %cst_23 = arith.constant dense<0.000000e+00> : vector<16x128xf32>
    %48 = tpu.matmul %46, %47, %cst_23 {dimension_numbers = #tpu.dot_dimension_numbers<[1], [0], [0], [1], [0, 0, 1, 1], [], []>} : vector<16x128xf32>, vector<128x128xf32>, vector<16x128xf32> -> vector<16x128xf32>
    %c0_24 = arith.constant 0 : index
    %c0_25 = arith.constant 0 : index
    %49 = vector.load %arg5[%c0_24, %c0_25] : memref<1x128xf32, #tpu.memory_space<vmem>>, vector<1x128xf32>
    %50 = vector.broadcast %49 : vector<1x128xf32> to vector<16x128xf32>
    %51 = arith.addf %48, %50 : vector<16x128xf32>
    %c0_26 = arith.constant 0 : index
    %c0_27 = arith.constant 0 : index
    %52 = vector.load %arg6[%c0_26, %c0_27] : memref<16x128xf32, #tpu.memory_space<vmem>>, vector<16x128xf32>
    tpu.vector_store %arg6[%c0_26, %c0_27], %51 {strides = array<i32>} : memref<16x128xf32, #tpu.memory_space<vmem>>, vector<16x128xf32>,
    return
  }
  func.func @transform_0(%arg0: i32) -> (i32, i32) {
    %c0_i32 = arith.constant 0 : i32
    %c0_i32_0 = arith.constant 0 : i32
    return %arg0, %c0_i32 : i32, i32
  }
  func.func @transform_1(%arg0: i32) -> (i32, i32) {
    %c0_i32 = arith.constant 0 : i32
    %c0_i32_0 = arith.constant 0 : i32
    %c0_i32_1 = arith.constant 0 : i32
    return %c0_i32, %c0_i32_0 : i32, i32
  }
  func.func @transform_2(%arg0: i32) -> (i32, i32) {
    %c0_i32 = arith.constant 0 : i32
    %c0_i32_0 = arith.constant 0 : i32
    %c0_i32_1 = arith.constant 0 : i32
    return %c0_i32, %c0_i32_0 : i32, i32
  }
  func.func @transform_3(%arg0: i32) -> (i32, i32) {
    %c0_i32 = arith.constant 0 : i32
    %c0_i32_0 = arith.constant 0 : i32
    %c0_i32_1 = arith.constant 0 : i32
    return %c0_i32, %c0_i32_0 : i32, i32
  }
  func.func @transform_4(%arg0: i32) -> (i32, i32) {
    %c0_i32 = arith.constant 0 : i32
    %c0_i32_0 = arith.constant 0 : i32
    %c0_i32_1 = arith.constant 0 : i32
    return %c0_i32, %c0_i32_0 : i32, i32
  }
  func.func @transform_5(%arg0: i32) -> (i32, i32) {
    %c0_i32 = arith.constant 0 : i32
    %c0_i32_0 = arith.constant 0 : i32
    return %arg0, %c0_i32 : i32, i32
  }
}

</mosaic_0001>

<bundles_post_ra>
// kernel: tpu_custom_call.1
= control target key start
LH: loop header
LB: loop body
LE: loop exit
PB: predicated region body
PF: predicated region fallthrough
CT: control target
= control target key end

     0   :  { %10 = vsyncpa [#allocation3], 0  ;;  %s725_s0 = inlined_call_operand.hbm [shape: f32[16,128], index: 0, kind: input, shape index: {}]   ;;  %s726_s1 = inlined_call_operand.hbm [shape: f32[128,128], index: 1, kind: input, shape index: {}]   ;;  %s727_s2 = inlined_call_operand.vmem [shape: f32[1,128], index: 2, kind: input, shape index: {}]   ;;  %s728_s3 = inlined_call_operand.hbm [shape: f32[128,128], index: 3, kind: input, shape index: {}]   ;;  %s729_s4 = inlined_call_operand.vmem [shape: f32[1,128], index: 4, kind: input, shape index: {}]   ;;  %s730_s5 = inlined_call_operand.hbm [shape: f32[16,128], index: 5, kind: output, shape index: {}]  }
   0x1   :  { %11 = vsyncpa [#allocation6], 0 }
   0x2   :  { %12 = vsyncpa [#allocation4], 0  ;;  %s615_s18 = smov [#allocation5]   ;;  %s616_s20 = smov [#allocation2]  }
   0x3   :  { %s30_s19 = sshll.u32 %s615_s18, 4  ;;  %s18_s21 = sshll.u32 %s616_s20, 4  ;;  %s31_s19 = int_to_ptr.vmem [resolvable:$true] %s30_s19  ;;  %s652_s21 = int_to_ptr.vmem [resolvable:$true] %s18_s21 }
   0x4   :  { %s521_s24 = scalar_lea.hbm %s726_s1, 2048 }
   0x5   :  { %p522_p0 = scmp.ne.s32.totalorder %s726_s1, %s521_s24  ;;  %p525_p1 = scmp.lt.u32.totalorder %s521_s24, %s726_s1 }
   0x7   :  { %p527_p2 = pnand %p525_p1, %p522_p0 }
   0x9   :  { %530 = shalt.err (!%p527_p2)
}
   0xa   :  { %s531_s29 = scalar_lea.vmem %s31_s19, 2048  ;;  %p536_p4 = scmp.lt.s32.totalorder %s31_s19, %s31_s19 }
   0xb   :  { %p532_p3 = scmp.ne.s32.totalorder %s31_s19, %s531_s29  ;;  %p537_p5 = scmp.lt.s32.totalorder %s531_s29, %s531_s29 }
   0xd   :  { %p538_p6 = por %p537_p5, %p536_p4 }
   0xf   :  { %p539_p7 = pnand %p538_p6, %p532_p3 }
  0x11   :  { %542 = shalt.err (!%p539_p7)
}
  0x12   :  { %s617_s30 = smov 128   ;;  %s618_s6 = smov 8  }
  0x13   :  { %36 = dma.hbm_to_vmem [thread:$0]  %s726_s1, 2048, %s31_s19, [#allocation6], %s617_s30, %s617_s30, %s618_s6  }
  0x14   :  { %s543_s11 = scalar_lea.hbm %s725_s0, 256 }
  0x15   :  { %p544_p8 = scmp.ne.s32.totalorder %s725_s0, %s543_s11  ;;  %p547_p9 = scmp.lt.u32.totalorder %s543_s11, %s725_s0 }
  0x17   :  { %p549_p10 = pnand %p547_p9, %p544_p8 }
  0x19   :  { %552 = shalt.err (!%p549_p10)
}
  0x1a   :  { %s553_s16 = scalar_lea.vmem %s652_s21, 256  ;;  %p558_p12 = scmp.lt.s32.totalorder %s652_s21, %s652_s21 }
  0x1b   :  { %p554_p11 = scmp.ne.s32.totalorder %s652_s21, %s553_s16  ;;  %p559_p13 = scmp.lt.s32.totalorder %s553_s16, %s553_s16 }
  0x1d   :  { %p560_p0 = por %p559_p13, %p558_p12 }
  0x1f   :  { %p561_p1 = pnand %p560_p0, %p554_p11 }
  0x21   :  { %564 = shalt.err (!%p561_p1)
}
  0x22   :  { %24 = dma.hbm_to_vmem [thread:$0]  %s725_s0, 256, %s652_s21, [#allocation3], %s617_s30, %s617_s30, %s618_s6  }
  0x23   :  { %s619_s18 = smov [#allocation7]   ;;  %s565_s23 = scalar_lea.hbm %s728_s3, 2048 }
  0x24   :  { %s44_s19 = sshll.u32 %s619_s18, 4  ;;  %p566_p2 = scmp.ne.s32.totalorder %s728_s3, %s565_s23  ;;  %s45_s19 = int_to_ptr.vmem [resolvable:$true] %s44_s19 }
  0x25   :  { %p569_p3 = scmp.lt.u32.totalorder %s565_s23, %s728_s3 }
  0x27   :  { %p571_p4 = pnand %p569_p3, %p566_p2 }
  0x29   :  { %574 = shalt.err (!%p571_p4)
}
  0x2a   :  { %s575_s28 = scalar_lea.vmem %s45_s19, 2048  ;;  %p580_p6 = scmp.lt.s32.totalorder %s45_s19, %s45_s19 }
  0x2b   :  { %p576_p5 = scmp.ne.s32.totalorder %s45_s19, %s575_s28  ;;  %p581_p7 = scmp.lt.s32.totalorder %s575_s28, %s575_s28 }
  0x2d   :  { %p582_p8 = por %p581_p7, %p580_p6 }
  0x2f   :  { %p583_p9 = pnand %p582_p8, %p576_p5 }
  0x31   :  { %586 = shalt.err (!%p583_p9)
}
  0x32   :  { %50 = dma.hbm_to_vmem [thread:$0]  %s728_s3, 2048, %s45_s19, [#allocation6], %s617_s30, %s617_s30, %s618_s6  }
  0x33   :  { %609 = dma.done.wait [#allocation3], 256  }
  0x34   :  { %610 = vsyncadd [#allocation3], 4294967040 }
  0x35   :  { %611 = dma.done.wait [#allocation6], 4096  }
  0x36   :  { %612 = vsyncadd [#allocation6], 4294963200  ;;  %v64_v0 = vld [vmem:[#allocation5] sm:$0xff]  ;;  %v65_v1 = vld [vmem:[#allocation5 + $0x8] sm:$0xff]  ;;  %s621_s8 = smov [#allocation8]  }
  0x37   :  { %v66_v2 = vld [vmem:[#allocation5 + $0x10] sm:$0xff]  ;;  %v442_v3 = vpack.c.bf16 %v65_v1, %v64_v0  ;;  %v67_v4 = vld [vmem:[#allocation5 + $0x18] sm:$0xff]  ;;  %v68_v6 = vld [vmem:[#allocation5 + $0x20] sm:$0xff]  ;;  %s321_s9 = sshll.u32 %s621_s8, 4  ;;  %s322_s9 = int_to_ptr.vmem [resolvable:$true] %s321_s9 }
  0x38   :  { %v446_v5 = vpack.c.bf16 %v67_v4, %v66_v2  ;;  %v69_v7 = vld [vmem:[#allocation5 + $0x28] sm:$0xff]  ;;  %v62_v9 = vld [vmem:[#allocation2] sm:$0xff]  ;;  %v71_v11 = vld [vmem:[#allocation5 + $0x38] sm:$0xff]  ;;  %s587_s10 = scalar_lea.vmem %s322_s9, 256  ;;  %p592_p11 = scmp.lt.s32.totalorder %s322_s9, %s322_s9 }
  0x39   :  { %443 = vmatprep.subr.bf16.mxu0 %v442_v3  ;;  %v450_v8 = vpack.c.bf16 %v69_v7, %v68_v6  ;;  %v70_v10 = vld [vmem:[#allocation5 + $0x30] sm:$0xff]  ;;  %404 = vmatprep.mubr.f32.mxu0 %v62_v9  ;;  %v72_v13 = vld [vmem:[#allocation5 + $0x40] sm:$0xff]  ;;  %v73_v14 = vld [vmem:[#allocation5 + $0x48] sm:$0xff]  ;;  %p588_p10 = scmp.ne.s32.totalorder %s322_s9, %s587_s10  ;;  %p593_p12 = scmp.lt.s32.totalorder %s587_s10, %s587_s10 }
  0x3a   :  { %445 = vmatpush3.bf16.msra.mxu0 %v442_v3  ;;  %v454_v12 = vpack.c.bf16 %v71_v11, %v70_v10  ;;  %v458_v15 = vpack.c.bf16 %v73_v14, %v72_v13  ;;  %v74_v16 = vld [vmem:[#allocation5 + $0x50] sm:$0xff]  ;;  %v75_v17 = vld [vmem:[#allocation5 + $0x58] sm:$0xff]  ;;  %v76_v19 = vld [vmem:[#allocation5 + $0x60] sm:$0xff] }
  0x3b   :  { %447 = vmatprep.subr.bf16.mxu0 %v446_v5  ;;  %v462_v18 = vpack.c.bf16 %v75_v17, %v74_v16  ;;  %v77_v20 = vld [vmem:[#allocation5 + $0x68] sm:$0xff]  ;;  %v78_v22 = vld [vmem:[#allocation5 + $0x70] sm:$0xff]  ;;  %v79_v23 = vld [vmem:[#allocation5 + $0x78] sm:$0xff]  ;;  %p594_p13 = por %p593_p12, %p592_p11 }
  0x3c   :  { %v466_v21 = vpack.c.bf16 %v77_v20, %v76_v19  ;;  %v470_v24 = vpack.c.bf16 %v79_v23, %v78_v22  ;;  %v63_v25 = vld [vmem:[#allocation2 + $0x8] sm:$0xff]  ;;  %v216_v26 = vld [vmem:[#allocation7] sm:$0xff]  ;;  %v217_v27 = vld [vmem:[#allocation7 + $0x8] sm:$0xff] }
  0x3d   :  { %v218_v28 = vld [vmem:[#allocation7 + $0x10] sm:$0xff]  ;;  %v474_v29 = vpack.c.bf16 %v217_v27, %v216_v26  ;;  %v219_v30 = vld [vmem:[#allocation7 + $0x18] sm:$0xff]  ;;  %v220_v32 = vld [vmem:[#allocation7 + $0x20] sm:$0xff]  ;;  %p595_p0 = pnand %p594_p13, %p588_p10 }
  0x3e   :  { %449 = vmatpush3.bf16.msra.mxu0 %v446_v5  ;;  %v478_v31 = vpack.c.bf16 %v219_v30, %v218_v28  ;;  %v221_v33 = vld [vmem:[#allocation7 + $0x28] sm:$0xff]  ;;  %v222_v35 = vld [vmem:[#allocation7 + $0x30] sm:$0xff]  ;;  %v223_v36 = vld [vmem:[#allocation7 + $0x38] sm:$0xff]  ;;  %v620_v30 = vmov 1.0  }
  0x3f   :  { %451 = vmatprep.subr.bf16.mxu0 %v450_v8  ;;  %475 = vmatprep.subr.bf16.mxu1 %v474_v29  ;;  %v482_v34 = vpack.c.bf16 %v221_v33, %v220_v32  ;;  %v486_v37 = vpack.c.bf16 %v223_v36, %v222_v35  ;;  %v224_v38 = vld [vmem:[#allocation7 + $0x40] sm:$0xff]  ;;  %v225_v39 = vld [vmem:[#allocation7 + $0x48] sm:$0xff]  ;;  %v226_v41 = vld [vmem:[#allocation7 + $0x50] sm:$0xff] }
  0x40   :  { %477 = vmatpush3.bf16.msra.mxu1 %v474_v29  ;;  %v490_v40 = vpack.c.bf16 %v225_v39, %v224_v38  ;;  %v227_v42 = vld [vmem:[#allocation7 + $0x58] sm:$0xff]  ;;  %v228_v44 = vld [vmem:[#allocation7 + $0x60] sm:$0xff]  ;;  %v229_v45 = vld [vmem:[#allocation7 + $0x68] sm:$0xff] }
  0x41   :  { %479 = vmatprep.subr.bf16.mxu1 %v478_v31  ;;  %v494_v43 = vpack.c.bf16 %v227_v42, %v226_v41  ;;  %v498_v46 = vpack.c.bf16 %v229_v45, %v228_v44  ;;  %v230_v47 = vld [vmem:[#allocation7 + $0x70] sm:$0xff]  ;;  %v231_v48 = vld [vmem:[#allocation7 + $0x78] sm:$0xff] }
  0x42   :  { %453 = vmatpush3.bf16.msra.mxu0 %v450_v8  ;;  %v502_v49 = vpack.c.bf16 %v231_v48, %v230_v47  ;;  %v334_v50 = vld [vmem:[%s727_s2] ss:$0 sm:$0xff] }
  0x43   :  { %455 = vmatprep.subr.bf16.mxu0 %v454_v12  ;;  %v335_v42 = vld [vmem:[%s729_s4] ss:$0 sm:$0xff] }
  0x44   :  { %481 = vmatpush3.bf16.msra.mxu1 %v478_v31 }
  0x45   :  { %483 = vmatprep.subr.bf16.mxu1 %v482_v34 }
  0x46   :  { %457 = vmatpush3.bf16.msra.mxu0 %v454_v12 }
  0x47   :  { %459 = vmatprep.subr.bf16.mxu0 %v458_v15 }
  0x48   :  { %485 = vmatpush3.bf16.msra.mxu1 %v482_v34 }
  0x49   :  { %487 = vmatprep.subr.bf16.mxu1 %v486_v37 }
  0x4a   :  { %461 = vmatpush3.bf16.msra.mxu0 %v458_v15 }
  0x4b   :  { %463 = vmatprep.subr.bf16.mxu0 %v462_v18 }
  0x4c   :  { %489 = vmatpush3.bf16.msra.mxu1 %v486_v37 }
  0x4d   :  { %491 = vmatprep.subr.bf16.mxu1 %v490_v40 }
  0x4e   :  { %465 = vmatpush3.bf16.msra.mxu0 %v462_v18 }
  0x4f   :  { %467 = vmatprep.subr.bf16.mxu0 %v466_v21 }
  0x50   :  { %493 = vmatpush3.bf16.msra.mxu1 %v490_v40 }
  0x51   :  { %495 = vmatprep.subr.bf16.mxu1 %v494_v43 }
  0x52   :  { %469 = vmatpush3.bf16.msra.mxu0 %v466_v21 }
  0x53   :  { %471 = vmatprep.subr.bf16.mxu0 %v470_v24 }
  0x54   :  { %497 = vmatpush3.bf16.msra.mxu1 %v494_v43 }
  0x55   :  { %499 = vmatprep.subr.bf16.mxu1 %v498_v46 }
  0x56   :  { %473 = vmatpush3.bf16.msra.mxu0 %v470_v24 }
  0x58   :  { %501 = vmatpush3.bf16.msra.mxu1 %v498_v46 }
  0x59   :  { %405 = vmatmul.mubr.f32.vlgmr.msra.gmra.mrb[0].mxu0 %v63_v25  ;;  %503 = vmatprep.subr.bf16.mxu1 %v502_v49 }
  0x5c   :  { %505 = vmatpush3.bf16.msra.mxu1 %v502_v49 }
 0x12c   :  { %v406_v51 = vpop.f32.mrb[0].mxu0 }
 0x12d   :  { %v159_v52 = vadd.f32 %v406_v51, %v334_v50  ;;  %v153_v53 = vpop.f32.mrb[1].mxu0 }
 0x12e   :  { %v154_v54 = vadd.f32 %v334_v50, %v153_v53 }
 0x12f   :  { %v165_v55 = vmul.f32 0.70710677, %v159_v52  ;;  %v163_v39 = vmul.f32 0.5, %v159_v52 }
 0x130   :  { %v164_v56 = vmul.f32 0.70710677, %v154_v54  ;;  %v162_v37 = vmul.f32 0.5, %v154_v54 }
 0x131   :  { %v171_v57 = vand.u32 2147483647, %v165_v55  ;;  %vm167_vm0 = vcmp.lt.f32.partialorder %v165_v55, 0.0 }
 0x132   :  { %v170_v58 = vand.u32 2147483647, %v164_v56  ;;  %vm166_vm1 = vcmp.lt.f32.partialorder %v164_v56, 0.0  ;;  %v169_v31 = vsel %vm167_vm0, -1.0, %v620_v30 }
 0x133   :  { %v173_v59 = vmul.f32 0.3275911, %v171_v57  ;;  %v199_v63 = vsub.f32 0.0, %v171_v57  ;;  %v168_v33 = vsel %vm166_vm1, -1.0, %v620_v30 }
 0x134   :  { %v172_v60 = vmul.f32 0.3275911, %v170_v58  ;;  %v198_v0 = vsub.f32 0.0, %v170_v58 }
 0x135   :  { %v175_v61 = vadd.f32 1.0, %v173_v59  ;;  %v201_v2 = vmul.f32 %v199_v63, %v171_v57 }
 0x136   :  { %v174_v62 = vadd.f32 1.0, %v172_v60  ;;  %v200_v4 = vmul.f32 %v198_v0, %v170_v58 }
 0x137   :  { %513 = vrcp.f32 %v175_v61  ;;  %v204_v8 = vmul.f32 1.442695, %v201_v2 }
 0x138   :  { %515 = vrcp.f32 %v174_v62  ;;  %v202_v10 = vmul.f32 1.442695, %v200_v4 }
 0x139   :  { %517 = vpow2.f32 %v204_v8 }
 0x13a   :  { %519 = vpow2.f32 %v202_v10 }
 0x141   :  { %v514_v1 = vpop.eup %513 }
 0x142   :  { %v516_v3 = vpop.eup %515  ;;  %v181_v5 = vmul.f32 1.0614054, %v514_v1 }
 0x143   :  { %v180_v6 = vmul.f32 1.0614054, %v516_v3  ;;  %v518_v24 = vpop.eup %517 }
 0x144   :  { %v183_v7 = vadd.f32 -1.4531521, %v181_v5  ;;  %v520_v26 = vpop.eup %519 }
 0x145   :  { %v182_v9 = vadd.f32 -1.4531521, %v180_v6 }
 0x146   :  { %v185_v11 = vmul.f32 %v514_v1, %v183_v7 }
 0x147   :  { %v184_v12 = vmul.f32 %v516_v3, %v182_v9 }
 0x148   :  { %v187_v13 = vadd.f32 1.4214138, %v185_v11 }
 0x149   :  { %v186_v14 = vadd.f32 1.4214138, %v184_v12 }
 0x14a   :  { %v189_v15 = vmul.f32 %v514_v1, %v187_v13 }
 0x14b   :  { %v188_v16 = vmul.f32 %v516_v3, %v186_v14 }
 0x14c   :  { %v191_v17 = vadd.f32 -0.28449672, %v189_v15 }
 0x14d   :  { %v190_v18 = vadd.f32 -0.28449672, %v188_v16 }
 0x14e   :  { %v193_v19 = vmul.f32 %v514_v1, %v191_v17 }
 0x14f   :  { %v192_v20 = vmul.f32 %v516_v3, %v190_v18 }
 0x150   :  { %v195_v21 = vadd.f32 0.2548296, %v193_v19 }
 0x151   :  { %v194_v22 = vadd.f32 0.2548296, %v192_v20 }
 0x152   :  { %v197_v23 = vmul.f32 %v514_v1, %v195_v21 }
 0x153   :  { %v196_v25 = vmul.f32 %v516_v3, %v194_v22 }
 0x154   :  { %v207_v27 = vmul.f32 %v518_v24, %v197_v23 }
 0x155   :  { %v206_v28 = vmul.f32 %v520_v26, %v196_v25 }
 0x156   :  { %v209_v29 = vsub.f32 1.0, %v207_v27 }
 0x157   :  { %v208_v32 = vsub.f32 1.0, %v206_v28 }
 0x158   :  { %v211_v34 = vmul.f32 %v209_v29, %v169_v31 }
 0x159   :  { %v210_v35 = vmul.f32 %v208_v32, %v168_v33 }
 0x15a   :  { %v213_v36 = vadd.f32 1.0, %v211_v34 }
 0x15b   :  { %v212_v38 = vadd.f32 1.0, %v210_v35 }
 0x15c   :  { %v215_v41 = vmul.f32 %v213_v36, %v163_v39 }
 0x15d   :  { %v214_v40 = vmul.f32 %v212_v38, %v162_v37 }
 0x15f   :  { %439 = vmatprep.mubr.f32.mxu1 %v214_v40 }
 0x160   :  { %440 = vmatmul.mubr.f32.vlgmr.msra.gmra.mrb[0].mxu1 %v215_v41 }
 0x233   :  { %v441_v43 = vpop.f32.mrb[0].mxu1 }
 0x234   :  { %v311_v44 = vadd.f32 %v441_v43, %v335_v42  ;;  %v305_v45 = vpop.f32.mrb[1].mxu1 }
 0x235   :  { %v306_v46 = vadd.f32 %v335_v42, %v305_v45 }
 0x236   :  { %315 = vst [vmem:[#allocation8 + $0x8] sm:$0xff] %v311_v44 }
 0x237   :  { %314 = vst [vmem:[#allocation8] sm:$0xff] %v306_v46 }
 0x238   :  { %598 = shalt.err (!%p595_p0)
}
 0x239   :  { %s599_s4 = scalar_lea.hbm %s730_s5, 256 }
 0x23a   :  { %p600_p1 = scmp.ne.s32.totalorder %s730_s5, %s599_s4  ;;  %p603_p2 = scmp.lt.u32.totalorder %s599_s4, %s730_s5 }
 0x23c   :  { %p605_p3 = pnand %p603_p2, %p600_p1 }
 0x23e   :  { %608 = shalt.err (!%p605_p3)
}
 0x23f   :  { %327 = dma.vmem_to_hbm [thread:$0]  %s322_s9, 256, %s730_s5, [#allocation4], %s617_s30, %s617_s30, %s618_s6  }
 0x240   :  { %613 = dma.done.wait [#allocation4], 256  }
 0x241   :  { %614 = vsyncadd [#allocation4], 4294967040 }
 0x242   :  { %331 = vsyncpa [#allocation3], 1 }
 0x243   :  { %332 = vsyncpa [#allocation6], 1 }
 0x244   :  { %333 = vsyncpa [#allocation4], 1 }

</bundles_post_ra>
